<compile_context>
chip_gen: v5e
topology: v5e:2x2
jax: 0.10.0
libtpu: 0.0.40
codegen_flags: <defaults>
</compile_context>

<pallas_src>
import jax
import jax.numpy as jnp
from jax.experimental import pallas as pl
from jax.experimental.pallas import tpu as pltpu

NEURONS = 5          # hidden width of the PyTorch module
IN_FEATS = 1         # Net(inputs=1)
LANE = 128           # batch points packed lane-dense: 128 points per VMEM row
TILE_ROWS_MAX = 512  # (512,128) f32 tile = 256 KiB -> ~1 MiB with double-buffering

# Offsets into the flattened parameter vector (SMEM-resident).
_W1, _B1, _W2, _B2, _W3, _B3 = 0, 5, 10, 35, 40, 45
_NPARAMS = 46


def _mlp_kernel(p_ref, x_ref, o_ref):
    """Lane-dense MLP tile: each element of the (T,128) tile is one batch point.

    Weights/biases are 46 f32 scalars read from SMEM and broadcast into VPU
    FMAs; the 5 tanh per point go to the EUP.  No MXU dots.
    """
    x = x_ref[...]                                                  # (T, 128) f32

    # Linear(1, 5): h1[j] = x * w1[j] + b1[j]
    h1 = [x * p_ref[_W1 + j] + p_ref[_B1 + j] for j in range(NEURONS)]

    # Linear(5, 5) + Tanh: h2[k] = tanh(b2[k] + sum_j h1[j] * w2[k, j])
    h2 = []
    for k in range(NEURONS):
        acc = h1[0] * p_ref[_W2 + NEURONS * k + 0] + p_ref[_B2 + k]
        for j in range(1, NEURONS):
            acc = acc + h1[j] * p_ref[_W2 + NEURONS * k + j]
        h2.append(jnp.tanh(acc))

    # Linear(5, 1): out = b3 + sum_k h2[k] * w3[k]
    out = h2[0] * p_ref[_W3 + 0] + p_ref[_B3]
    for k in range(1, NEURONS):
        out = out + h2[k] * p_ref[_W3 + k]

    o_ref[...] = out                                                # lane-dense store


@jax.jit
def net_forward(x, params):
    """Mirrors Net.forward: self.net(x.reshape(-1, 1)).squeeze()."""
    w1, b1, w2, b2, w3, b3 = params  # PyTorch shapes: (5,1),(5,),(5,5),(5,),(1,5),(1,)

    x_flat = jnp.reshape(x, (-1,)).astype(jnp.float32)              # (N,)
    n = x_flat.shape[0]

    # Lane-dense packing: rows of 128 batch points, rows a multiple of 8 (and of
    # the tile when tiled) so every block is (8,128)-tile friendly.
    rows = -(-n // LANE)
    rows = max(8, -(-rows // 8) * 8)
    if rows > TILE_ROWS_MAX:
        tile_rows = TILE_ROWS_MAX
        rows = -(-rows // tile_rows) * tile_rows
    else:
        tile_rows = rows
    grid = rows // tile_rows
    n_pad = rows * LANE

    if n_pad != n:
        x_flat = jnp.pad(x_flat, (0, n_pad - n))                    # < one tile of padding
    x2d = jnp.reshape(x_flat, (rows, LANE))                         # free (contiguous)

    # All 46 parameter scalars as one small SMEM-resident vector.
    p = jnp.concatenate([
        jnp.reshape(w1, (-1,)), jnp.reshape(b1, (-1,)),
        jnp.reshape(w2, (-1,)), jnp.reshape(b2, (-1,)),
        jnp.reshape(w3, (-1,)), jnp.reshape(b3, (-1,)),
    ]).astype(jnp.float32)                                          # (46,)

    out2d = pl.pallas_call(
        _mlp_kernel,
        out_shape=jax.ShapeDtypeStruct((rows, LANE), jnp.float32),
        grid=(grid,),
        in_specs=[
            pl.BlockSpec(memory_space=pltpu.MemorySpace.SMEM),      # params (whole, SMEM)
            pl.BlockSpec((tile_rows, LANE), lambda i: (i, 0)),      # batch tile
        ],
        out_specs=pl.BlockSpec((tile_rows, LANE), lambda i: (i, 0)),
        compiler_params=pltpu.CompilerParams(
            dimension_semantics=("parallel",),
            vmem_limit_bytes=32 * 1024 * 1024,
        ),
    )(p, x2d)

    # Valid outputs are the first n lane-dense elements; squeeze like PyTorch
    # (.squeeze() on (N,1) -> (N,), 0-d scalar when N == 1).
    return jnp.squeeze(jnp.reshape(out2d, (-1,))[:n])


def init_params(key, inputs=IN_FEATS, neurons=NEURONS):
    """Deterministic init matching nn.Linear's U(-1/sqrt(fan_in), 1/sqrt(fan_in))."""
    ks = jax.random.split(key, 6)

    def linear(kw, kb, fan_in, fan_out):
        bound = 1.0 / jnp.sqrt(jnp.float32(fan_in))
        w = jax.random.uniform(kw, (fan_out, fan_in), jnp.float32, -bound, bound)
        b = jax.random.uniform(kb, (fan_out,), jnp.float32, -bound, bound)
        return w, b

    w1, b1 = linear(ks[0], ks[1], inputs, neurons)    # Linear(1, 5)
    w2, b2 = linear(ks[2], ks[3], neurons, neurons)   # Linear(5, 5)
    w3, b3 = linear(ks[4], ks[5], neurons, 1)         # Linear(5, 1)
    return (w1, b1, w2, b2, w3, b3)


def net_forward_ref(x, params):
    """Pure-JAX reference of the PyTorch forward."""
    w1, b1, w2, b2, w3, b3 = params
    h = jnp.reshape(x, (-1, 1)).astype(jnp.float32)
    h = h @ w1.T + b1
    h = jnp.tanh(h @ w2.T + b2)
    h = h @ w3.T + b3
    return jnp.squeeze(h)


if __name__ == "__main__":
    key = jax.random.PRNGKey(0)
    k_params, k_x = jax.random.split(key)

    params = init_params(k_params)
    x = jax.random.normal(k_x, (2, 8), dtype=jnp.float32)   # -> reshape(-1,1): 16 points

    out = jax.block_until_ready(net_forward(x, params))
    ref = net_forward_ref(x, params)

    assert out.shape == ref.shape == (16,), (out.shape, ref.shape)
    assert jnp.allclose(out, ref, atol=1e-5, rtol=1e-5), (out, ref)

    print("KERNEL_OK")
</pallas_src>

<mosaic_0001>
module attributes {stable_mosaic.version = 11 : i64} {
  func.func @_mlp_kernel(%arg0: i32, %arg1: memref<46xf32, #tpu.memory_space<smem>>, %arg2: memref<8x128xf32, #tpu.memory_space<vmem>>, %arg3: memref<8x128xf32, #tpu.memory_space<vmem>>) attributes {dimension_semantics = [#tpu.dimension_semantics<parallel>], iteration_bounds = array<i64: 1>, scalar_prefetch = 0 : i64, scratch_operands = 0 : i64, tpu.core_type = #tpu.core_type<tc>, window_params = [{transform_indices = @transform_0, window_bounds = array<i64: 46>}, {transform_indices = @transform_1, window_bounds = array<i64: 8, 128>}, {transform_indices = @transform_2, window_bounds = array<i64: 8, 128>}]} {
    %c0 = arith.constant 0 : index
    %c0_0 = arith.constant 0 : index
    %0 = vector.load %arg2[%c0, %c0_0] : memref<8x128xf32, #tpu.memory_space<vmem>>, vector<8x128xf32>
    %c0_1 = arith.constant 0 : index
    %1 = memref.load %arg1[%c0_1] : memref<46xf32, #tpu.memory_space<smem>>
    %2 = vector.broadcast %1 : f32 to vector<8x128xf32>
    %3 = arith.mulf %0, %2 : vector<8x128xf32>
    %c5 = arith.constant 5 : index
    %4 = memref.load %arg1[%c5] : memref<46xf32, #tpu.memory_space<smem>>
    %5 = vector.broadcast %4 : f32 to vector<8x128xf32>
    %6 = arith.addf %3, %5 : vector<8x128xf32>
    %c1 = arith.constant 1 : index
    %7 = memref.load %arg1[%c1] : memref<46xf32, #tpu.memory_space<smem>>
    %8 = vector.broadcast %7 : f32 to vector<8x128xf32>
    %9 = arith.mulf %0, %8 : vector<8x128xf32>
    %c6 = arith.constant 6 : index
    %10 = memref.load %arg1[%c6] : memref<46xf32, #tpu.memory_space<smem>>
    %11 = vector.broadcast %10 : f32 to vector<8x128xf32>
    %12 = arith.addf %9, %11 : vector<8x128xf32>
    %c2 = arith.constant 2 : index
    %13 = memref.load %arg1[%c2] : memref<46xf32, #tpu.memory_space<smem>>
    %14 = vector.broadcast %13 : f32 to vector<8x128xf32>
    %15 = arith.mulf %0, %14 : vector<8x128xf32>
    %c7 = arith.constant 7 : index
    %16 = memref.load %arg1[%c7] : memref<46xf32, #tpu.memory_space<smem>>
    %17 = vector.broadcast %16 : f32 to vector<8x128xf32>
    %18 = arith.addf %15, %17 : vector<8x128xf32>
    %c3 = arith.constant 3 : index
    %19 = memref.load %arg1[%c3] : memref<46xf32, #tpu.memory_space<smem>>
    %20 = vector.broadcast %19 : f32 to vector<8x128xf32>
    %21 = arith.mulf %0, %20 : vector<8x128xf32>
    %c8 = arith.constant 8 : index
    %22 = memref.load %arg1[%c8] : memref<46xf32, #tpu.memory_space<smem>>
    %23 = vector.broadcast %22 : f32 to vector<8x128xf32>
    %24 = arith.addf %21, %23 : vector<8x128xf32>
    %c4 = arith.constant 4 : index
    %25 = memref.load %arg1[%c4] : memref<46xf32, #tpu.memory_space<smem>>
    %26 = vector.broadcast %25 : f32 to vector<8x128xf32>
    %27 = arith.mulf %0, %26 : vector<8x128xf32>
    %c9 = arith.constant 9 : index
    %28 = memref.load %arg1[%c9] : memref<46xf32, #tpu.memory_space<smem>>
    %29 = vector.broadcast %28 : f32 to vector<8x128xf32>
    %30 = arith.addf %27, %29 : vector<8x128xf32>
    %c10 = arith.constant 10 : index
    %31 = memref.load %arg1[%c10] : memref<46xf32, #tpu.memory_space<smem>>
    %32 = vector.broadcast %31 : f32 to vector<8x128xf32>
    %33 = arith.mulf %6, %32 : vector<8x128xf32>
    %c35 = arith.constant 35 : index
    %34 = memref.load %arg1[%c35] : memref<46xf32, #tpu.memory_space<smem>>
    %35 = vector.broadcast %34 : f32 to vector<8x128xf32>
    %36 = arith.addf %33, %35 : vector<8x128xf32>
    %c11 = arith.constant 11 : index
    %37 = memref.load %arg1[%c11] : memref<46xf32, #tpu.memory_space<smem>>
    %38 = vector.broadcast %37 : f32 to vector<8x128xf32>
    %39 = arith.mulf %12, %38 : vector<8x128xf32>
    %40 = arith.addf %36, %39 : vector<8x128xf32>
    %c12 = arith.constant 12 : index
    %41 = memref.load %arg1[%c12] : memref<46xf32, #tpu.memory_space<smem>>
    %42 = vector.broadcast %41 : f32 to vector<8x128xf32>
    %43 = arith.mulf %18, %42 : vector<8x128xf32>
    %44 = arith.addf %40, %43 : vector<8x128xf32>
    %c13 = arith.constant 13 : index
    %45 = memref.load %arg1[%c13] : memref<46xf32, #tpu.memory_space<smem>>
    %46 = vector.broadcast %45 : f32 to vector<8x128xf32>
    %47 = arith.mulf %24, %46 : vector<8x128xf32>
    %48 = arith.addf %44, %47 : vector<8x128xf32>
    %c14 = arith.constant 14 : index
    %49 = memref.load %arg1[%c14] : memref<46xf32, #tpu.memory_space<smem>>
    %50 = vector.broadcast %49 : f32 to vector<8x128xf32>
    %51 = arith.mulf %30, %50 : vector<8x128xf32>
    %52 = arith.addf %48, %51 : vector<8x128xf32>
    %53 = math.tanh %52 : vector<8x128xf32>
    %c15 = arith.constant 15 : index
    %54 = memref.load %arg1[%c15] : memref<46xf32, #tpu.memory_space<smem>>
    %55 = vector.broadcast %54 : f32 to vector<8x128xf32>
    %56 = arith.mulf %6, %55 : vector<8x128xf32>
    %c36 = arith.constant 36 : index
    %57 = memref.load %arg1[%c36] : memref<46xf32, #tpu.memory_space<smem>>
    %58 = vector.broadcast %57 : f32 to vector<8x128xf32>
    %59 = arith.addf %56, %58 : vector<8x128xf32>
    %c16 = arith.constant 16 : index
    %60 = memref.load %arg1[%c16] : memref<46xf32, #tpu.memory_space<smem>>
    %61 = vector.broadcast %60 : f32 to vector<8x128xf32>
    %62 = arith.mulf %12, %61 : vector<8x128xf32>
    %63 = arith.addf %59, %62 : vector<8x128xf32>
    %c17 = arith.constant 17 : index
    %64 = memref.load %arg1[%c17] : memref<46xf32, #tpu.memory_space<smem>>
    %65 = vector.broadcast %64 : f32 to vector<8x128xf32>
    %66 = arith.mulf %18, %65 : vector<8x128xf32>
    %67 = arith.addf %63, %66 : vector<8x128xf32>
    %c18 = arith.constant 18 : index
    %68 = memref.load %arg1[%c18] : memref<46xf32, #tpu.memory_space<smem>>
    %69 = vector.broadcast %68 : f32 to vector<8x128xf32>
    %70 = arith.mulf %24, %69 : vector<8x128xf32>
    %71 = arith.addf %67, %70 : vector<8x128xf32>
    %c19 = arith.constant 19 : index
    %72 = memref.load %arg1[%c19] : memref<46xf32, #tpu.memory_space<smem>>
    %73 = vector.broadcast %72 : f32 to vector<8x128xf32>
    %74 = arith.mulf %30, %73 : vector<8x128xf32>
    %75 = arith.addf %71, %74 : vector<8x128xf32>
    %76 = math.tanh %75 : vector<8x128xf32>
    %c20 = arith.constant 20 : index
    %77 = memref.load %arg1[%c20] : memref<46xf32, #tpu.memory_space<smem>>
    %78 = vector.broadcast %77 : f32 to vector<8x128xf32>
    %79 = arith.mulf %6, %78 : vector<8x128xf32>
    %c37 = arith.constant 37 : index
    %80 = memref.load %arg1[%c37] : memref<46xf32, #tpu.memory_space<smem>>
    %81 = vector.broadcast %80 : f32 to vector<8x128xf32>
    %82 = arith.addf %79, %81 : vector<8x128xf32>
    %c21 = arith.constant 21 : index
    %83 = memref.load %arg1[%c21] : memref<46xf32, #tpu.memory_space<smem>>
    %84 = vector.broadcast %83 : f32 to vector<8x128xf32>
    %85 = arith.mulf %12, %84 : vector<8x128xf32>
    %86 = arith.addf %82, %85 : vector<8x128xf32>
    %c22 = arith.constant 22 : index
    %87 = memref.load %arg1[%c22] : memref<46xf32, #tpu.memory_space<smem>>
    %88 = vector.broadcast %87 : f32 to vector<8x128xf32>
    %89 = arith.mulf %18, %88 : vector<8x128xf32>
    %90 = arith.addf %86, %89 : vector<8x128xf32>
    %c23 = arith.constant 23 : index
    %91 = memref.load %arg1[%c23] : memref<46xf32, #tpu.memory_space<smem>>
    %92 = vector.broadcast %91 : f32 to vector<8x128xf32>
    %93 = arith.mulf %24, %92 : vector<8x128xf32>
    %94 = arith.addf %90, %93 : vector<8x128xf32>
    %c24 = arith.constant 24 : index
    %95 = memref.load %arg1[%c24] : memref<46xf32, #tpu.memory_space<smem>>
    %96 = vector.broadcast %95 : f32 to vector<8x128xf32>
    %97 = arith.mulf %30, %96 : vector<8x128xf32>
    %98 = arith.addf %94, %97 : vector<8x128xf32>
    %99 = math.tanh %98 : vector<8x128xf32>
    %c25 = arith.constant 25 : index
    %100 = memref.load %arg1[%c25] : memref<46xf32, #tpu.memory_space<smem>>
    %101 = vector.broadcast %100 : f32 to vector<8x128xf32>
    %102 = arith.mulf %6, %101 : vector<8x128xf32>
    %c38 = arith.constant 38 : index
    %103 = memref.load %arg1[%c38] : memref<46xf32, #tpu.memory_space<smem>>
    %104 = vector.broadcast %103 : f32 to vector<8x128xf32>
    %105 = arith.addf %102, %104 : vector<8x128xf32>
    %c26 = arith.constant 26 : index
    %106 = memref.load %arg1[%c26] : memref<46xf32, #tpu.memory_space<smem>>
    %107 = vector.broadcast %106 : f32 to vector<8x128xf32>
    %108 = arith.mulf %12, %107 : vector<8x128xf32>
    %109 = arith.addf %105, %108 : vector<8x128xf32>
    %c27 = arith.constant 27 : index
    %110 = memref.load %arg1[%c27] : memref<46xf32, #tpu.memory_space<smem>>
    %111 = vector.broadcast %110 : f32 to vector<8x128xf32>
    %112 = arith.mulf %18, %111 : vector<8x128xf32>
    %113 = arith.addf %109, %112 : vector<8x128xf32>
    %c28 = arith.constant 28 : index
    %114 = memref.load %arg1[%c28] : memref<46xf32, #tpu.memory_space<smem>>
    %115 = vector.broadcast %114 : f32 to vector<8x128xf32>
    %116 = arith.mulf %24, %115 : vector<8x128xf32>
    %117 = arith.addf %113, %116 : vector<8x128xf32>
    %c29 = arith.constant 29 : index
    %118 = memref.load %arg1[%c29] : memref<46xf32, #tpu.memory_space<smem>>
    %119 = vector.broadcast %118 : f32 to vector<8x128xf32>
    %120 = arith.mulf %30, %119 : vector<8x128xf32>
    %121 = arith.addf %117, %120 : vector<8x128xf32>
    %122 = math.tanh %121 : vector<8x128xf32>
    %c30 = arith.constant 30 : index
    %123 = memref.load %arg1[%c30] : memref<46xf32, #tpu.memory_space<smem>>
    %124 = vector.broadcast %123 : f32 to vector<8x128xf32>
    %125 = arith.mulf %6, %124 : vector<8x128xf32>
    %c39 = arith.constant 39 : index
    %126 = memref.load %arg1[%c39] : memref<46xf32, #tpu.memory_space<smem>>
    %127 = vector.broadcast %126 : f32 to vector<8x128xf32>
    %128 = arith.addf %125, %127 : vector<8x128xf32>
    %c31 = arith.constant 31 : index
    %129 = memref.load %arg1[%c31] : memref<46xf32, #tpu.memory_space<smem>>
    %130 = vector.broadcast %129 : f32 to vector<8x128xf32>
    %131 = arith.mulf %12, %130 : vector<8x128xf32>
    %132 = arith.addf %128, %131 : vector<8x128xf32>
    %c32 = arith.constant 32 : index
    %133 = memref.load %arg1[%c32] : memref<46xf32, #tpu.memory_space<smem>>
    %134 = vector.broadcast %133 : f32 to vector<8x128xf32>
    %135 = arith.mulf %18, %134 : vector<8x128xf32>
    %136 = arith.addf %132, %135 : vector<8x128xf32>
    %c33 = arith.constant 33 : index
    %137 = memref.load %arg1[%c33] : memref<46xf32, #tpu.memory_space<smem>>
    %138 = vector.broadcast %137 : f32 to vector<8x128xf32>
    %139 = arith.mulf %24, %138 : vector<8x128xf32>
    %140 = arith.addf %136, %139 : vector<8x128xf32>
    %c34 = arith.constant 34 : index
    %141 = memref.load %arg1[%c34] : memref<46xf32, #tpu.memory_space<smem>>
    %142 = vector.broadcast %141 : f32 to vector<8x128xf32>
    %143 = arith.mulf %30, %142 : vector<8x128xf32>
    %144 = arith.addf %140, %143 : vector<8x128xf32>
    %145 = math.tanh %144 : vector<8x128xf32>
    %c40 = arith.constant 40 : index
    %146 = memref.load %arg1[%c40] : memref<46xf32, #tpu.memory_space<smem>>
    %147 = vector.broadcast %146 : f32 to vector<8x128xf32>
    %148 = arith.mulf %53, %147 : vector<8x128xf32>
    %c45 = arith.constant 45 : index
    %149 = memref.load %arg1[%c45] : memref<46xf32, #tpu.memory_space<smem>>
    %150 = vector.broadcast %149 : f32 to vector<8x128xf32>
    %151 = arith.addf %148, %150 : vector<8x128xf32>
    %c41 = arith.constant 41 : index
    %152 = memref.load %arg1[%c41] : memref<46xf32, #tpu.memory_space<smem>>
    %153 = vector.broadcast %152 : f32 to vector<8x128xf32>
    %154 = arith.mulf %76, %153 : vector<8x128xf32>
    %155 = arith.addf %151, %154 : vector<8x128xf32>
    %c42 = arith.constant 42 : index
    %156 = memref.load %arg1[%c42] : memref<46xf32, #tpu.memory_space<smem>>
    %157 = vector.broadcast %156 : f32 to vector<8x128xf32>
    %158 = arith.mulf %99, %157 : vector<8x128xf32>
    %159 = arith.addf %155, %158 : vector<8x128xf32>
    %c43 = arith.constant 43 : index
    %160 = memref.load %arg1[%c43] : memref<46xf32, #tpu.memory_space<smem>>
    %161 = vector.broadcast %160 : f32 to vector<8x128xf32>
    %162 = arith.mulf %122, %161 : vector<8x128xf32>
    %163 = arith.addf %159, %162 : vector<8x128xf32>
    %c44 = arith.constant 44 : index
    %164 = memref.load %arg1[%c44] : memref<46xf32, #tpu.memory_space<smem>>
    %165 = vector.broadcast %164 : f32 to vector<8x128xf32>
    %166 = arith.mulf %145, %165 : vector<8x128xf32>
    %167 = arith.addf %163, %166 : vector<8x128xf32>
    %c0_2 = arith.constant 0 : index
    %c0_3 = arith.constant 0 : index
    %168 = vector.load %arg3[%c0_2, %c0_3] : memref<8x128xf32, #tpu.memory_space<vmem>>, vector<8x128xf32>
    tpu.vector_store %arg3[%c0_2, %c0_3], %167 {strides = array<i32>} : memref<8x128xf32, #tpu.memory_space<vmem>>, vector<8x128xf32>,
    return
  }
  func.func @transform_0(%arg0: i32) -> i32 {
    %c0_i32 = arith.constant 0 : i32
    %c0_i32_0 = arith.constant 0 : i32
    return %c0_i32 : i32
  }
  func.func @transform_1(%arg0: i32) -> (i32, i32) {
    %c0_i32 = arith.constant 0 : i32
    %c0_i32_0 = arith.constant 0 : i32
    return %arg0, %c0_i32 : i32, i32
  }
  func.func @transform_2(%arg0: i32) -> (i32, i32) {
    %c0_i32 = arith.constant 0 : i32
    %c0_i32_0 = arith.constant 0 : i32
    return %arg0, %c0_i32 : i32, i32
  }
}

</mosaic_0001>

<bundles_post_ra>
// kernel: net_forward.1
= control target key start
LH: loop header
LB: loop body
LE: loop exit
PB: predicated region body
PF: predicated region fallthrough
CT: control target
= control target key end

     0   :  { %7 = vsyncpa [#allocation3], 0  ;;  %s268_s12 = smov [#allocation2]   ;;  %s346_s0 = inlined_call_operand.vmem [shape: f32[46], index: 0, kind: input, shape index: {}]   ;;  %s347_s1 = inlined_call_operand.vmem [shape: f32[8,128], index: 1, kind: input, shape index: {}]   ;;  %s348_s2 = inlined_call_operand.vmem [shape: f32[8,128], index: 2, kind: output, shape index: {}]  }
   0x1   :  { %s13_s11 = sshll.u32 %s346_s0, 4  ;;  %s14_s11 = int_to_ptr.vmem [resolvable:$true] %s13_s11 }
   0x2   :  { %16 = dma.vmem_to_smem %s14_s11, 16, %s268_s12, [#allocation3]  }
   0x3   :  { %266 = dma.done.wait [#allocation3], 16  }
   0x4   :  { %267 = vsyncadd [#allocation3], 4294967280 }
   0x5   :  { %23 = sfence }
   0x6   :  { %s25_s13 = sld [smem:[#allocation2]]  ;;  %v24_v0 = vld [vmem:[%s347_s1] sm:$0xff] }
   0x7   :  { %s198_s14 = sld [smem:[#allocation2 + $0x5]] }
   0x8   :  { %s199_s15 = sld [smem:[#allocation2 + $0x1]] }
   0x9   :  { %s200_s16 = sld [smem:[#allocation2 + $0x6]] }
   0xa   :  { %s201_s17 = sld [smem:[#allocation2 + $0x2]] }
   0xb   :  { %s202_s18 = sld [smem:[#allocation2 + $0x7]] }
   0xc   :  { %v26_v1 = vstv %s25_s13  ;;  %s203_s21 = sld [smem:[#allocation2 + $0x3]] }
   0xd   :  { %s290_s22 = sld [smem:[#allocation2 + $0x8]]  ;;  %v27_v3 = vmul.f32 %v26_v1, %v24_v0  ;;  %v29_v4 = vstv %s198_s14 }
   0xe   :  { %v32_v2 = vstv %s199_s15  ;;  %s292_s0 = sld [smem:[#allocation2 + $0x4]] }
   0xf   :  { %s294_s23 = sld [smem:[#allocation2 + $0x9]]  ;;  %v33_v5 = vmul.f32 %v32_v2, %v24_v0  ;;  %v35_v7 = vstv %s200_s16  ;;  %v296_v8 = vadd.f32 %v29_v4, %v27_v3 }
  0x10   :  { %s207_s24 = sld [smem:[#allocation2 + $0xa]]  ;;  %v38_v6 = vstv %s201_s17 }
  0x11   :  { %s208_s25 = sld [smem:[#allocation2 + $0x23]]  ;;  %v39_v9 = vmul.f32 %v38_v6, %v24_v0  ;;  %v300_v11 = vadd.f32 %v35_v7, %v33_v5  ;;  %v41_v12 = vstv %s202_s18 }
  0x12   :  { %s209_s26 = sld [smem:[#allocation2 + $0xb]]  ;;  %v44_v10 = vstv %s203_s21 }
  0x13   :  { %s210_s1 = sld [smem:[#allocation2 + $0xc]]  ;;  %v45_v14 = vmul.f32 %v44_v10, %v24_v0  ;;  %v305_v17 = vadd.f32 %v41_v12, %v39_v9  ;;  %v47_v18 = vstv %s290_s22 }
  0x14   :  { %s298_s27 = sld [smem:[#allocation2 + $0xd]]  ;;  %v50_v19 = vstv %s292_s0 }
  0x15   :  { %s302_s28 = sld [smem:[#allocation2 + $0xe]]  ;;  %v310_v24 = vadd.f32 %v47_v18, %v45_v14  ;;  %v51_v25 = vmul.f32 %v50_v19, %v24_v0  ;;  %v53_v26 = vstv %s294_s23 }
  0x16   :  { %v56_v13 = vstv %s207_s24  ;;  %s213_s29 = sld [smem:[#allocation2 + $0xf]] }
  0x17   :  { %v57_v15 = vmul.f32 %v56_v13, %v296_v8  ;;  %v59_v16 = vstv %s208_s25  ;;  %s214_s30 = sld [smem:[#allocation2 + $0x24]]  ;;  %v318_v34 = vadd.f32 %v53_v26, %v51_v25 }
  0x18   :  { %v62_v20 = vstv %s209_s26  ;;  %s215_s3 = sld [smem:[#allocation2 + $0x10]] }
  0x19   :  { %v60_v21 = vadd.f32 %v59_v16, %v57_v15  ;;  %v63_v22 = vmul.f32 %v62_v20, %v300_v11  ;;  %v66_v23 = vstv %s210_s1  ;;  %s216_s4 = sld [smem:[#allocation2 + $0x11]] }
  0x1a   :  { %s217_s5 = sld [smem:[#allocation2 + $0x12]]  ;;  %v67_v28 = vmul.f32 %v66_v23, %v305_v17  ;;  %v70_v30 = vstv %s298_s27 }
  0x1b   :  { %s312_s6 = sld [smem:[#allocation2 + $0x13]]  ;;  %v64_v27 = vadd.f32 %v63_v22, %v60_v21  ;;  %v71_v39 = vmul.f32 %v70_v30, %v310_v24  ;;  %v74_v42 = vstv %s302_s28 }
  0x1c   :  { %v79_v29 = vstv %s213_s29  ;;  %s219_s7 = sld [smem:[#allocation2 + $0x14]]  ;;  %v75_v51 = vmul.f32 %v74_v42, %v318_v34 }
  0x1d   :  { %v80_v31 = vmul.f32 %v79_v29, %v296_v8  ;;  %v82_v32 = vstv %s214_s30  ;;  %s220_s8 = sld [smem:[#allocation2 + $0x25]]  ;;  %v68_v38 = vadd.f32 %v67_v28, %v64_v27 }
  0x1e   :  { %v85_v33 = vstv %s215_s3  ;;  %s221_s9 = sld [smem:[#allocation2 + $0x15]] }
  0x1f   :  { %v83_v35 = vadd.f32 %v82_v32, %v80_v31  ;;  %v86_v36 = vmul.f32 %v85_v33, %v300_v11  ;;  %v89_v37 = vstv %s216_s4  ;;  %s222_s10 = sld [smem:[#allocation2 + $0x16]]  ;;  %v72_v50 = vadd.f32 %v71_v39, %v68_v38 }
  0x20   :  { %v90_v40 = vmul.f32 %v89_v37, %v305_v17  ;;  %v93_v41 = vstv %s217_s5  ;;  %s223_s11 = sld [smem:[#allocation2 + $0x17]] }
  0x21   :  { %v87_v43 = vadd.f32 %v86_v36, %v83_v35  ;;  %s224_s12 = sld [smem:[#allocation2 + $0x18]]  ;;  %v94_v44 = vmul.f32 %v93_v41, %v310_v24  ;;  %v97_v47 = vstv %s312_s6  ;;  %v76_v63 = vadd.f32 %v75_v51, %v72_v50 }
  0x22   :  { %v102_v45 = vstv %s219_s7  ;;  %s225_s13 = sld [smem:[#allocation2 + $0x19]]  ;;  %v98_v57 = vmul.f32 %v97_v47, %v318_v34 }
  0x23   :  { %v91_v46 = vadd.f32 %v90_v40, %v87_v43  ;;  %v103_v48 = vmul.f32 %v102_v45, %v296_v8  ;;  %v105_v49 = vstv %s220_s8  ;;  %s226_s14 = sld [smem:[#allocation2 + $0x26]]  ;;  %244 = vtanh.f32 %v76_v63 }
  0x24   :  { %v108_v52 = vstv %s221_s9  ;;  %s227_s15 = sld [smem:[#allocation2 + $0x1a]] }
  0x25   :  { %v106_v53 = vadd.f32 %v105_v49, %v103_v48  ;;  %v109_v54 = vmul.f32 %v108_v52, %v300_v11  ;;  %v112_v55 = vstv %s222_s10  ;;  %s228_s16 = sld [smem:[#allocation2 + $0x1b]]  ;;  %v95_v56 = vadd.f32 %v94_v44, %v91_v46 }
  0x26   :  { %v113_v58 = vmul.f32 %v112_v55, %v305_v17  ;;  %v116_v59 = vstv %s223_s11  ;;  %s229_s17 = sld [smem:[#allocation2 + $0x1c]] }
  0x27   :  { %v110_v60 = vadd.f32 %v109_v54, %v106_v53  ;;  %v117_v61 = vmul.f32 %v116_v59, %v310_v24  ;;  %v120_v62 = vstv %s224_s12  ;;  %s230_s18 = sld [smem:[#allocation2 + $0x1d]]  ;;  %v99_v5 = vadd.f32 %v98_v57, %v95_v56 }
  0x28   :  { %v125_v0 = vstv %s225_s13  ;;  %s231_s19 = sld [smem:[#allocation2 + $0x1e]]  ;;  %v121_v2 = vmul.f32 %v120_v62, %v318_v34 }
  0x29   :  { %v114_v1 = vadd.f32 %v113_v58, %v110_v60  ;;  %v126_v3 = vmul.f32 %v125_v0, %v296_v8  ;;  %v128_v4 = vstv %s226_s14  ;;  %s232_s20 = sld [smem:[#allocation2 + $0x27]]  ;;  %246 = vtanh.f32 %v99_v5  ;;  %v245_v31 = vpop.eup %244 }
  0x2a   :  { %v131_v6 = vstv %s227_s15  ;;  %s233_s21 = sld [smem:[#allocation2 + $0x1f]] }
  0x2b   :  { %v118_v7 = vadd.f32 %v117_v61, %v114_v1  ;;  %v129_v9 = vadd.f32 %v128_v4, %v126_v3  ;;  %v132_v10 = vmul.f32 %v131_v6, %v300_v11  ;;  %v135_v12 = vstv %s228_s16  ;;  %s234_s22 = sld [smem:[#allocation2 + $0x20]] }
  0x2c   :  { %v136_v13 = vmul.f32 %v135_v12, %v305_v17  ;;  %v139_v14 = vstv %s229_s17  ;;  %s235_s0 = sld [smem:[#allocation2 + $0x21]] }
  0x2d   :  { %v122_v15 = vadd.f32 %v121_v2, %v118_v7  ;;  %v133_v16 = vadd.f32 %v132_v10, %v129_v9  ;;  %v140_v18 = vmul.f32 %v139_v14, %v310_v24  ;;  %v143_v19 = vstv %s230_s18  ;;  %s236_s23 = sld [smem:[#allocation2 + $0x22]] }
  0x2e   :  { %v144_v20 = vmul.f32 %v143_v19, %v318_v34  ;;  %v148_v21 = vstv %s231_s19  ;;  %s237_s24 = sld [smem:[#allocation2 + $0x28]] }
  0x2f   :  { %248 = vtanh.f32 %v122_v15  ;;  %v137_v22 = vadd.f32 %v136_v13, %v133_v16  ;;  %v149_v23 = vmul.f32 %v148_v21, %v296_v8  ;;  %v151_v25 = vstv %s232_s20  ;;  %s238_s25 = sld [smem:[#allocation2 + $0x2d]]  ;;  %v247_v38 = vpop.eup %246 }
  0x30   :  { %v154_v26 = vstv %s233_s21  ;;  %s239_s26 = sld [smem:[#allocation2 + $0x29]] }
  0x31   :  { %v141_v27 = vadd.f32 %v140_v18, %v137_v22  ;;  %v152_v28 = vadd.f32 %v151_v25, %v149_v23  ;;  %v155_v29 = vmul.f32 %v154_v26, %v300_v11  ;;  %v158_v30 = vstv %s234_s22  ;;  %s240_s1 = sld [smem:[#allocation2 + $0x2a]] }
  0x32   :  { %v159_v32 = vmul.f32 %v158_v30, %v305_v17  ;;  %v162_v33 = vstv %s235_s0  ;;  %s241_s27 = sld [smem:[#allocation2 + $0x2b]] }
  0x33   :  { %v145_v35 = vadd.f32 %v144_v20, %v141_v27  ;;  %v156_v36 = vadd.f32 %v155_v29, %v152_v28  ;;  %v163_v37 = vmul.f32 %v162_v33, %v310_v24  ;;  %v166_v8 = vstv %s236_s23  ;;  %s242_s28 = sld [smem:[#allocation2 + $0x2c]] }
  0x34   :  { %v167_v39 = vmul.f32 %v166_v8, %v318_v34  ;;  %v171_v40 = vstv %s237_s24 }
  0x35   :  { %v249_v41 = vpop.eup %248  ;;  %250 = vtanh.f32 %v145_v35  ;;  %v160_v42 = vadd.f32 %v159_v32, %v156_v36  ;;  %v172_v11 = vmul.f32 %v245_v31, %v171_v40  ;;  %v174_v43 = vstv %s238_s25 }
  0x36   :  { %v177_v44 = vstv %s239_s26 }
  0x37   :  { %v164_v45 = vadd.f32 %v163_v37, %v160_v42  ;;  %v175_v46 = vadd.f32 %v174_v43, %v172_v11  ;;  %v178_v17 = vmul.f32 %v247_v38, %v177_v44  ;;  %v181_v47 = vstv %s240_s1 }
  0x38   :  { %v182_v48 = vmul.f32 %v249_v41, %v181_v47  ;;  %v185_v24 = vstv %s241_s27 }
  0x39   :  { %v168_v49 = vadd.f32 %v167_v39, %v164_v45  ;;  %v179_v50 = vadd.f32 %v178_v17, %v175_v46  ;;  %v189_v53 = vstv %s242_s28 }
  0x3b   :  { %v251_v51 = vpop.eup %250  ;;  %252 = vtanh.f32 %v168_v49  ;;  %v183_v52 = vadd.f32 %v182_v48, %v179_v50 }
  0x3c   :  { %v186_v34 = vmul.f32 %v251_v51, %v185_v24 }
  0x3e   :  { %v187_v54 = vadd.f32 %v186_v34, %v183_v52 }
  0x41   :  { %v253_v55 = vpop.eup %252 }
  0x42   :  { %v190_v56 = vmul.f32 %v253_v55, %v189_v53 }
  0x44   :  { %v191_v57 = vadd.f32 %v190_v56, %v187_v54 }
  0x46   :  { %192 = vst [vmem:[%s348_s2] sm:$0xff] %v191_v57 }
  0x47   :  { %197 = vsyncpa [#allocation3], 1 }

</bundles_post_ra>
